<compile_context>
chip_gen: v7x
topology: tpu7x:2x2x1
jax: 0.10.0
libtpu: 0.0.40
codegen_flags: <defaults>
</compile_context>

<pallas_src>
import functools

import jax
import jax.numpy as jnp
from jax.experimental import pallas as pl
from jax.experimental.pallas import tpu as pltpu


# --------------------- fused BN + ReLU + 1x1-conv kernel ---------------------

def _fused_kernel(gamma_ref, beta_ref, w_ref, x_ref, o_ref, a_ref, *,
                  m_count, eps):
    # gamma/beta: (Cin, 1) f32      w: (tn, Cin) f32
    # x: (Cin, M) f32 (fully resident, constant block index)
    # o: (tn, M)                    a (scratch): (Cin, M) bf16

    # Stats + BN affine + ReLU once per core (first inner step on this core).
    @pl.when(pl.program_id(1) == 0)
    def _():
        x = x_ref[...].astype(jnp.float32)                      # (Cin, M)
        # Per-channel sums via the MXU (dot against ones) -> keeps the XLU idle.
        ones = jnp.ones((x.shape[1], 128), dtype=jnp.float32)
        mean = jnp.dot(x, ones,
                       preferred_element_type=jnp.float32)[:, :1] / m_count
        xc = x - mean                                           # centered
        var = jnp.dot(xc * xc, ones,
                      preferred_element_type=jnp.float32)[:, :1] / m_count
        inv_std = jax.lax.rsqrt(var + eps)
        scale = gamma_ref[...] * inv_std                        # (Cin, 1)
        # BN affine (on centered x) + ReLU, stored as bf16 matmul operand.
        a_ref[...] = jnp.maximum(xc * scale + beta_ref[...], 0.0
                                 ).astype(a_ref.dtype)

    # 1x1 conv as matmul: bf16 operands, f32 accumulation on the MXU.
    o_ref[...] = jnp.dot(w_ref[...].astype(jnp.bfloat16), a_ref[...],
                         preferred_element_type=jnp.float32).astype(o_ref.dtype)


# ------------------------------ tile selection ------------------------------

def _pick_cout_tile(cout, cin, m):
    """Largest Cout tile from {512,256,128} that divides Cout, gives enough
    grid steps for megacore, and keeps the per-step VMEM working set under a
    v7x-safe budget. Falls back to a single full-Cout block."""
    budget = 24 << 20   # v7x has 64 MiB VMEM per TensorCore; stay well under.

    def fits(tn):
        ws = (8 * tn * cin     # weight block, f32, double-buffered
              + 8 * tn * m     # output block, f32, double-buffered
              + 8 * cin * m    # resident x, f32 (double-buffer allocation)
              + 2 * cin * m    # bf16 activation scratch
              + (1 << 20))     # ones constant + headroom
        return ws <= budget

    for min_tiles in (4, 2, 1):
        for tn in (512, 256, 128):
            if cout % tn == 0 and cout // tn >= min_tiles and fits(tn):
                return tn
    # TODO(synk): very large Cin*M (resident x no longer fits VMEM) would need
    # the tiled two-pass variant; irrelevant for this module's shapes.
    return cout


# --------------------------------- wrapper ----------------------------------

def batchnorm_relu_conv1x1(x_nchw, gamma, beta, w_oihw, eps=1e-5):
    N, Cin, H, W = x_nchw.shape
    Cout = w_oihw.shape[0]
    M = N * H * W

    # Channel-major (Cin, M): for N == 1 (the module's case) this is a free
    # reshape of NCHW — no transpose, no padding, no post-slice.
    if N == 1:
        x2d = x_nchw.reshape(Cin, M)
    else:
        x2d = jnp.transpose(x_nchw, (1, 0, 2, 3)).reshape(Cin, M)
    w2d = w_oihw.reshape(Cout, Cin)
    g2d = gamma.astype(jnp.float32).reshape(Cin, 1)
    b2d = beta.astype(jnp.float32).reshape(Cin, 1)

    tn = _pick_cout_tile(Cout, Cin, M)
    n_ct = Cout // tn
    n_par = 2 if (n_ct >= 2 and n_ct % 2 == 0) else 1   # megacore split (v7x)
    n_inner = n_ct // n_par

    kernel = functools.partial(_fused_kernel, m_count=float(M), eps=float(eps))

    out2d = pl.pallas_call(
        kernel,
        out_shape=jax.ShapeDtypeStruct((Cout, M), x_nchw.dtype),
        grid=(n_par, n_inner),
        in_specs=[
            pl.BlockSpec((Cin, 1), lambda c, j: (0, 0)),                # gamma
            pl.BlockSpec((Cin, 1), lambda c, j: (0, 0)),                # beta
            pl.BlockSpec((tn, Cin), lambda c, j: (c * n_inner + j, 0)), # weight
            pl.BlockSpec((Cin, M), lambda c, j: (0, 0)),                # x
        ],
        out_specs=pl.BlockSpec((tn, M), lambda c, j: (c * n_inner + j, 0)),
        scratch_shapes=[pltpu.VMEM((Cin, M), jnp.bfloat16)],            # relu(BN(x))
        compiler_params=pltpu.CompilerParams(
            dimension_semantics=("parallel", "arbitrary"),
            vmem_limit_bytes=32 * 1024 * 1024),
    )(g2d, b2d, w2d, x2d)

    # TODO(synk): running_mean / running_var updates (momentum=0.1) are
    # training-state side effects and do not affect the forward output.

    if N == 1:
        return out2d.reshape(1, Cout, H, W)
    return jnp.transpose(out2d.reshape(Cout, N, H, W), (1, 0, 2, 3))


if __name__ == "__main__":
    # Small shapes consistent with the module (original: [1,512,28,28] -> 2048).
    # H = W = 14 makes M = 196 (not a multiple of 128), exercising the
    # non-aligned full-M blocks just like the real M = 784.
    N, Cin, H, W = 1, 128, 14, 14
    Cout = 256
    eps = 1e-5

    key = jax.random.PRNGKey(0)
    kx, kg, kb, kw = jax.random.split(key, 4)
    x = jax.random.normal(kx, (N, Cin, H, W), dtype=jnp.float32)
    gamma = 1.0 + 0.1 * jax.random.normal(kg, (Cin,), dtype=jnp.float32)
    beta = 0.1 * jax.random.normal(kb, (Cin,), dtype=jnp.float32)
    w = 0.05 * jax.random.normal(kw, (Cout, Cin, 1, 1), dtype=jnp.float32)

    fn = jax.jit(lambda x_, g_, b_, w_: batchnorm_relu_conv1x1(x_, g_, b_, w_, eps=eps))
    out = jax.block_until_ready(fn(x, gamma, beta, w))
    assert out.shape == (N, Cout, H, W), out.shape

    # Pure-JAX f32 reference (training-mode BN over (N,H,W) per channel).
    mean_ref = jnp.mean(x, axis=(0, 2, 3), keepdims=True)
    var_ref = jnp.var(x, axis=(0, 2, 3), keepdims=True)
    xn = (x - mean_ref) / jnp.sqrt(var_ref + eps)
    xn = xn * gamma[None, :, None, None] + beta[None, :, None, None]
    xn = jnp.maximum(xn, 0.0)
    ref = jnp.einsum("nchw,oc->nohw", xn, w.reshape(Cout, Cin))

    # Matmul operands are bf16 (f32 accumulation), so compare against the f32
    # reference with a correspondingly loosened tolerance.
    assert jnp.allclose(out, ref, atol=2e-2, rtol=2e-2), \
        float(jnp.max(jnp.abs(out - ref)))
    print("KERNEL_OK")
</pallas_src>

<mosaic_0001>
module attributes {stable_mosaic.version = 11 : i64} {
  func.func @_fused_kernel(%arg0: i32, %arg1: i32, %arg2: memref<128x1xf32, #tpu.memory_space<vmem>>, %arg3: memref<128x1xf32, #tpu.memory_space<vmem>>, %arg4: memref<128x128xf32, #tpu.memory_space<vmem>>, %arg5: memref<128x196xf32, #tpu.memory_space<vmem>>, %arg6: memref<128x196xf32, #tpu.memory_space<vmem>>, %arg7: memref<128x196xbf16, #tpu.memory_space<vmem>>) attributes {dimension_semantics = [#tpu.dimension_semantics<parallel>, #tpu.dimension_semantics<arbitrary>], iteration_bounds = array<i64: 2, 1>, scalar_prefetch = 0 : i64, scratch_operands = 1 : i64, tpu.core_type = #tpu.core_type<tc>, window_params = [{pipeline_mode = #tpu.pipeline_mode<synchronous>, transform_indices = @transform_0, window_bounds = array<i64: 128, 1>}, {pipeline_mode = #tpu.pipeline_mode<synchronous>, transform_indices = @transform_1, window_bounds = array<i64: 128, 1>}, {transform_indices = @transform_2, window_bounds = array<i64: 128, 128>}, {pipeline_mode = #tpu.pipeline_mode<synchronous>, transform_indices = @transform_3, window_bounds = array<i64: 128, 196>}, {transform_indices = @transform_4, window_bounds = array<i64: 128, 196>}]} {
    %c0_i32 = arith.constant 0 : i32
    %0 = arith.cmpi eq, %arg1, %c0_i32 : i32
    %1 = arith.extui %0 : i1 to i32
    %c0_i32_0 = arith.constant 0 : i32
    %2 = arith.cmpi ne, %1, %c0_i32_0 : i32
    scf.if %2 {
      %c0_6 = arith.constant 0 : index
      %c0_7 = arith.constant 0 : index
      %8 = vector.load %arg5[%c0_6, %c0_7] : memref<128x196xf32, #tpu.memory_space<vmem>>, vector<128x196xf32>
      %cst_8 = arith.constant 1.000000e+00 : f32
      %9 = vector.broadcast %cst_8 : f32 to vector<196x128xf32>
      %cst_9 = arith.constant dense<0.000000e+00> : vector<128x128xf32>
      %10 = tpu.matmul %8, %9, %cst_9 {dimension_numbers = #tpu.dot_dimension_numbers<[1], [0], [0], [1], [0, 0, 1, 1], [], []>} : vector<128x196xf32>, vector<196x128xf32>, vector<128x128xf32> -> vector<128x128xf32>
      %11 = vector.extract_strided_slice %10 {offsets = [0, 0], sizes = [128, 1], strides = [1, 1]} : vector<128x128xf32> to vector<128x1xf32>
      %cst_10 = arith.constant 1.960000e+02 : f32
      %12 = vector.broadcast %cst_10 : f32 to vector<128x1xf32>
      %13 = arith.divf %11, %12 : vector<128x1xf32>
      %14 = vector.broadcast %13 : vector<128x1xf32> to vector<128x196xf32>
      %15 = arith.subf %8, %14 : vector<128x196xf32>
      %16 = arith.mulf %15, %15 : vector<128x196xf32>
      %cst_11 = arith.constant dense<0.000000e+00> : vector<128x128xf32>
      %17 = tpu.matmul %16, %9, %cst_11 {dimension_numbers = #tpu.dot_dimension_numbers<[1], [0], [0], [1], [0, 0, 1, 1], [], []>} : vector<128x196xf32>, vector<196x128xf32>, vector<128x128xf32> -> vector<128x128xf32>
      %18 = vector.extract_strided_slice %17 {offsets = [0, 0], sizes = [128, 1], strides = [1, 1]} : vector<128x128xf32> to vector<128x1xf32>
      %cst_12 = arith.constant 1.960000e+02 : f32
      %19 = vector.broadcast %cst_12 : f32 to vector<128x1xf32>
      %20 = arith.divf %18, %19 : vector<128x1xf32>
      %cst_13 = arith.constant 9.99999974E-6 : f32
      %21 = vector.broadcast %cst_13 : f32 to vector<128x1xf32>
      %22 = arith.addf %20, %21 : vector<128x1xf32>
      %23 = math.rsqrt %22 : vector<128x1xf32>
      %c0_14 = arith.constant 0 : index
      %c0_15 = arith.constant 0 : index
      %24 = vector.load %arg2[%c0_14, %c0_15] : memref<128x1xf32, #tpu.memory_space<vmem>>, vector<128x1xf32>
      %25 = arith.mulf %24, %23 : vector<128x1xf32>
      %26 = vector.broadcast %25 : vector<128x1xf32> to vector<128x196xf32>
      %27 = arith.mulf %15, %26 : vector<128x196xf32>
      %c0_16 = arith.constant 0 : index
      %c0_17 = arith.constant 0 : index
      %28 = vector.load %arg3[%c0_16, %c0_17] : memref<128x1xf32, #tpu.memory_space<vmem>>, vector<128x1xf32>
      %29 = vector.broadcast %28 : vector<128x1xf32> to vector<128x196xf32>
      %30 = arith.addf %27, %29 : vector<128x196xf32>
      %cst_18 = arith.constant 0.000000e+00 : f32
      %31 = vector.broadcast %cst_18 : f32 to vector<128x196xf32>
      %32 = arith.maximumf %30, %31 : vector<128x196xf32>
      %33 = arith.truncf %32 : vector<128x196xf32> to vector<128x196xbf16>
      %c0_19 = arith.constant 0 : index
      %c0_20 = arith.constant 0 : index
      %34 = vector.load %arg7[%c0_19, %c0_20] : memref<128x196xbf16, #tpu.memory_space<vmem>>, vector<128x196xbf16>
      tpu.vector_store %arg7[%c0_19, %c0_20], %33 {strides = array<i32>} : memref<128x196xbf16, #tpu.memory_space<vmem>>, vector<128x196xbf16>,
    } else {
    }
    %c0 = arith.constant 0 : index
    %c0_1 = arith.constant 0 : index
    %3 = vector.load %arg4[%c0, %c0_1] : memref<128x128xf32, #tpu.memory_space<vmem>>, vector<128x128xf32>
    %4 = arith.truncf %3 : vector<128x128xf32> to vector<128x128xbf16>
    %c0_2 = arith.constant 0 : index
    %c0_3 = arith.constant 0 : index
    %5 = vector.load %arg7[%c0_2, %c0_3] : memref<128x196xbf16, #tpu.memory_space<vmem>>, vector<128x196xbf16>
    %cst = arith.constant dense<0.000000e+00> : vector<128x196xf32>
    %6 = tpu.matmul %4, %5, %cst {dimension_numbers = #tpu.dot_dimension_numbers<[1], [0], [0], [1], [0, 0, 1, 1], [], []>} : vector<128x128xbf16>, vector<128x196xbf16>, vector<128x196xf32> -> vector<128x196xf32>
    %c0_4 = arith.constant 0 : index
    %c0_5 = arith.constant 0 : index
    %7 = vector.load %arg6[%c0_4, %c0_5] : memref<128x196xf32, #tpu.memory_space<vmem>>, vector<128x196xf32>
    tpu.vector_store %arg6[%c0_4, %c0_5], %6 {strides = array<i32>} : memref<128x196xf32, #tpu.memory_space<vmem>>, vector<128x196xf32>,
    return
  }
  func.func @transform_0(%arg0: i32, %arg1: i32) -> (i32, i32) {
    %c0_i32 = arith.constant 0 : i32
    %c0_i32_0 = arith.constant 0 : i32
    %c0_i32_1 = arith.constant 0 : i32
    return %c0_i32, %c0_i32_0 : i32, i32
  }
  func.func @transform_1(%arg0: i32, %arg1: i32) -> (i32, i32) {
    %c0_i32 = arith.constant 0 : i32
    %c0_i32_0 = arith.constant 0 : i32
    %c0_i32_1 = arith.constant 0 : i32
    return %c0_i32, %c0_i32_0 : i32, i32
  }
  func.func @transform_2(%arg0: i32, %arg1: i32) -> (i32, i32) {
    %c1_i32 = arith.constant 1 : i32
    %0 = arith.muli %arg0, %c1_i32 : i32
    %1 = arith.addi %0, %arg1 : i32
    %c0_i32 = arith.constant 0 : i32
    %c0_i32_0 = arith.constant 0 : i32
    return %1, %c0_i32 : i32, i32
  }
  func.func @transform_3(%arg0: i32, %arg1: i32) -> (i32, i32) {
    %c0_i32 = arith.constant 0 : i32
    %c0_i32_0 = arith.constant 0 : i32
    %c0_i32_1 = arith.constant 0 : i32
    return %c0_i32, %c0_i32_0 : i32, i32
  }
  func.func @transform_4(%arg0: i32, %arg1: i32) -> (i32, i32) {
    %c1_i32 = arith.constant 1 : i32
    %0 = arith.muli %arg0, %c1_i32 : i32
    %1 = arith.addi %0, %arg1 : i32
    %c0_i32 = arith.constant 0 : i32
    %c0_i32_0 = arith.constant 0 : i32
    return %1, %c0_i32 : i32, i32
  }
}

</mosaic_0001>

<bundles_post_ra>
// kernel: _lambda_.1
= control target key start
LH: loop header
LB: loop body
LE: loop exit
PB: predicated region body
PF: predicated region fallthrough
CT: control target
= control target key end

     0   :  { %s1684_s15 = smov 0   ;;  %s1686_s16 = smov 0   ;;  %s2354_s0 = inlined_call_operand.vmem [shape: f32[128,1], index: 0, kind: input, shape index: {}]   ;;  %s2355_s1 = inlined_call_operand.vmem [shape: f32[128,1], index: 1, kind: input, shape index: {}]   ;;  %s2356_s2 = inlined_call_operand.vmem [shape: f32[256,128], index: 2, kind: input, shape index: {}]   ;;  %s2357_s3 = inlined_call_operand.vmem [shape: f32[128,196], index: 3, kind: input, shape index: {}]   ;;  %s2358_s4 = inlined_call_operand.vmem [shape: f32[256,196], index: 4, kind: output, shape index: {}]  }
   0x1   :  { %s1688_s17 = smov 0  }
   0x2 LB: > { %s26_s18 = sadd.s32 1, %s1648_s16  ;;  %p1460_p0 = scmp.ge.s32.totalorder %s1652_s17, 1  ;;  %s1652_s17 = sphi %s1688_s17, %s14_s17   ;;  %s1648_s16 = sphi %s1686_s16, %s2360_s16   ;;  %s1644_s15 = sphi %s1684_s15, %s2359_s15  }
   0x3   : > { %p28_p1 = scmp.ge.s32.totalorder %s26_s18, 2  ;;  %p181_p2 = scmp.lt.s32.totalorder %s1652_s17, 3 }
   0x5   : > { %s2362_s18 = smov (%p28_p1, %s26_s18), 0  ;;  %p182_p3 = pnand %p1460_p0, %p181_p2 }
   0x6   : > { %v1707_v0 = vld [vmem:[%s2357_s3 + $0x8] sm:$0xff] (!%p182_p3)  ;;  %v1654_v1 = vmov (!%p182_p3), 0.0|0.0   ;;  %vm264_vm0 = vcmask (!%p182_p3), 556032   ;;  %v1655_v2 = vmov (!%p182_p3), 1.0|1.0   ;;  %v1656_v3 = vmov (!%p182_p3), 0.0  }
   0x7   : > { %185 = sbr.rel (%p182_p3) target bundleno = 1083 (0x43b), region = 36  ;;  %1503 = vmatprep.subr.bf16.mxu0 (!%p182_p3), %v1654_v1  ;;  %1527 = vmatprep.subr.bf16.mxu1 (!%p182_p3), %v1654_v1  ;;  %vm313_vm1 = vcmask (!%p182_p3), 1043456   ;;  %v1714_v4 = vld [vmem:[%s2357_s3] sm:$0xff] (!%p182_p3)  ;;  %v1719_v5 = vld [vmem:[%s2357_s3 + $0x18] sm:$0xff] (!%p182_p3)  ;;  %v1657_v6 = vmov (!%p182_p3), 1.0   ;;  %v1727_v7 = vld [vmem:[%s2357_s3 + $0x10] sm:$0xff] (!%p182_p3) }
   0x8   : > { %1504 = vmatpush1.bf16.msra.mxu0 (!%p182_p3), %v1655_v2  ;;  %1467 = vmatprep.mubr.msk.f32.mxu0 (!%p182_p3), %vm264_vm0, %v1707_v0  ;;  %v1732_v8 = vld [vmem:[%s2357_s3 + $0x28] sm:$0xff] (!%p182_p3)  ;;  %v1740_v9 = vld [vmem:[%s2357_s3 + $0x20] sm:$0xff] (!%p182_p3)  ;;  %v1745_v10 = vld [vmem:[%s2357_s3 + $0x38] sm:$0xff] (!%p182_p3)  ;;  %v1658_v36 = vmov (!%p182_p3), 0   ;;  %s1461_s11 = sshll.u32 (!%p182_p3), %s1644_s15, 4 }
   0x9   : > { %1505 = vmatprep.subr.bf16.mxu0 (!%p182_p3), %v1654_v1  ;;  %1528 = vmatpush1.bf16.msra.mxu1 (!%p182_p3), %v1655_v2  ;;  %v1753_v11 = vld [vmem:[%s2357_s3 + $0x30] sm:$0xff] (!%p182_p3)  ;;  %v1758_v12 = vld [vmem:[%s2357_s3 + $0x48] sm:$0xff] (!%p182_p3)  ;;  %v1766_v13 = vld [vmem:[%s2357_s3 + $0x40] sm:$0xff] (!%p182_p3)  ;;  %p212_p4 = scmp.lt.s32.totalorder (!%p182_p3), %s1461_s11, 31 }
   0xa   : > { %1529 = vmatprep.subr.bf16.mxu1 (!%p182_p3), %v1654_v1  ;;  %v1771_v14 = vld [vmem:[%s2357_s3 + $0x58] sm:$0xff] (!%p182_p3)  ;;  %v1779_v15 = vld [vmem:[%s2357_s3 + $0x50] sm:$0xff] (!%p182_p3)  ;;  %v1784_v16 = vld [vmem:[%s2357_s3 + $0x68] sm:$0xff] (!%p182_p3)  ;;  %1596 = vset.pattern.permute.xlu0 (!%p182_p3), %v1658_v36 }
   0xb   : > { %v1792_v17 = vld [vmem:[%s2357_s3 + $0x60] sm:$0xff] (!%p182_p3)  ;;  %v1797_v18 = vld [vmem:[%s2357_s3 + $0x78] sm:$0xff] (!%p182_p3)  ;;  %v1805_v19 = vld [vmem:[%s2357_s3 + $0x70] sm:$0xff] (!%p182_p3)  ;;  %1597 = vset.pattern.permute.xlu1 (!%p182_p3), %v1658_v36 }
   0xc   : > { %1506 = vmatpush1.bf16.msra.mxu0 (!%p182_p3), %v1655_v2  ;;  %v1810_v20 = vld [vmem:[%s2357_s3 + $0x88] sm:$0xff] (!%p182_p3)  ;;  %v1818_v21 = vld [vmem:[%s2357_s3 + $0x80] sm:$0xff] (!%p182_p3)  ;;  %v1823_v22 = vld [vmem:[%s2357_s3 + $0x98] sm:$0xff] (!%p182_p3) }
   0xd   : > { %1507 = vmatprep.subr.bf16.mxu0 (!%p182_p3), %v1654_v1  ;;  %1530 = vmatpush1.bf16.msra.mxu1 (!%p182_p3), %v1655_v2  ;;  %v1831_v23 = vld [vmem:[%s2357_s3 + $0x90] sm:$0xff] (!%p182_p3)  ;;  %v1836_v24 = vld [vmem:[%s2357_s3 + $0xa8] sm:$0xff] (!%p182_p3)  ;;  %v1844_v25 = vld [vmem:[%s2357_s3 + $0xa0] sm:$0xff] (!%p182_p3) }
   0xe   : > { %1531 = vmatprep.subr.bf16.mxu1 %v1654_v1  ;;  %v1849_v26 = vld [vmem:[%s2357_s3 + $0xb8] sm:$0xff]  ;;  %v1857_v27 = vld [vmem:[%s2357_s3 + $0xb0] sm:$0xff]  ;;  %v1862_v28 = vld [vmem:[%s2357_s3 + $0xc8] sm:$0xff]  ;;  %s2364_s11 = smov (!%p212_p4, %s1461_s11), 31 }
   0xf   : > { %v1870_v29 = vld [vmem:[%s2357_s3 + $0xc0] sm:$0xff]  ;;  %v1875_v30 = vld [vmem:[%s2357_s3 + $0xd8] sm:$0xff]  ;;  %v1883_v31 = vld [vmem:[%s2357_s3 + $0xd0] sm:$0xff]  ;;  %s1462_s15 = sshll.u32 %s2364_s11, 3  ;;  %s1502_s19 = sshll.u32 %s2364_s11, 4 }
  0x10   : > { %1508 = vmatpush1.bf16.msra.mxu0 %v1655_v2  ;;  %v1888_v32 = vld [vmem:[%s2357_s3 + $0xe8] sm:$0xff]  ;;  %v1896_v33 = vld [vmem:[%s2357_s3 + $0xe0] sm:$0xff]  ;;  %v1901_v34 = vld [vmem:[%s2357_s3 + $0xf8] sm:$0xff]  ;;  %s2267_s14 = scalar_lea.vmem %s2356_s2, %s1462_s15  ;;  %s2295_s22 = scalar_lea.vmem %s2358_s4, %s1502_s19 }
  0x11   : > { %1509 = vmatprep.subr.bf16.mxu0 %v1654_v1  ;;  %1532 = vmatpush1.bf16.msra.mxu1 %v1655_v2  ;;  %v1909_v35 = vld [vmem:[%s2357_s3 + $0xf0] sm:$0xff] }
  0x12   : > { %1533 = vmatprep.subr.bf16.mxu1 %v1654_v1 }
  0x14   : > { %1510 = vmatpush1.bf16.msra.mxu0 %v1655_v2 }
  0x15   : > { %1511 = vmatprep.subr.bf16.mxu0 %v1654_v1  ;;  %1534 = vmatpush1.bf16.msra.mxu1 %v1655_v2 }
  0x16   : > { %1535 = vmatprep.subr.bf16.mxu1 %v1654_v1 }
  0x18   : > { %1512 = vmatpush1.bf16.msra.mxu0 %v1655_v2 }
  0x19   : > { %1513 = vmatprep.subr.bf16.mxu0 %v1654_v1  ;;  %1536 = vmatpush1.bf16.msra.mxu1 %v1655_v2 }
  0x1a   : > { %1537 = vmatprep.subr.bf16.mxu1 %v1654_v1 }
  0x1c   : > { %1514 = vmatpush1.bf16.msra.mxu0 %v1655_v2 }
  0x1d   : > { %1515 = vmatprep.subr.bf16.mxu0 %v1654_v1  ;;  %1538 = vmatpush1.bf16.msra.mxu1 %v1655_v2 }
  0x1e   : > { %1539 = vmatprep.subr.bf16.mxu1 %v1654_v1 }
  0x20   : > { %1516 = vmatpush1.bf16.msra.mxu0 %v1655_v2 }
  0x21   : > { %1517 = vmatprep.subr.bf16.mxu0 %v1654_v1  ;;  %1540 = vmatpush1.bf16.msra.mxu1 %v1655_v2 }
  0x22   : > { %1541 = vmatprep.subr.bf16.mxu1 %v1654_v1 }
  0x24   : > { %1518 = vmatpush1.bf16.msra.mxu0 %v1655_v2 }
  0x25   : > { %1519 = vmatprep.subr.bf16.mxu0 %v1654_v1  ;;  %1542 = vmatpush1.bf16.msra.mxu1 %v1655_v2 }
  0x26   : > { %1543 = vmatprep.subr.bf16.mxu1 %v1654_v1 }
  0x28   : > { %1520 = vmatpush1.bf16.msra.mxu0 %v1655_v2 }
  0x29   : > { %1521 = vmatprep.subr.bf16.mxu0 %v1654_v1  ;;  %1544 = vmatpush1.bf16.msra.mxu1 %v1655_v2 }
  0x2a   : > { %1545 = vmatprep.subr.bf16.mxu1 %v1654_v1 }
  0x2c   : > { %1522 = vmatpush1.bf16.msra.mxu0 %v1655_v2 }
  0x2d   : > { %1523 = vmatprep.subr.bf16.mxu0 %v1654_v1  ;;  %1546 = vmatpush1.bf16.msra.mxu1 %v1655_v2 }
  0x2e   : > { %1547 = vmatprep.subr.bf16.mxu1 %v1654_v1 }
  0x30   : > { %1524 = vmatpush1.bf16.msra.mxu0 %v1655_v2 }
  0x31   : > { %1525 = vmatprep.subr.bf16.mxu0 %v1654_v1  ;;  %1548 = vmatpush1.bf16.msra.mxu1 %v1655_v2 }
  0x32   : > { %1549 = vmatprep.subr.bf16.mxu1 %v1654_v1 }
  0x34   : > { %1526 = vmatpush1.bf16.msra.mxu0 %v1655_v2 }
  0x35   : > { %365 = vmatprep.subr.mxu0 %v1656_v3  ;;  %1550 = vmatpush1.bf16.msra.mxu1 %v1655_v2 }
  0x36   : > { %719 = vmatprep.subr.mxu1 %v1656_v3 }
  0x38   : > { %1466 = vmatpush1.msk.msra.mxu0 %vm313_vm1, %v1657_v6 }
  0x39   : > { %382 = vmatmul.mubr.f32.vlgmr.msra.gmra.mrb[0].mxu0 %v1714_v4  ;;  %1483 = vmatpush1.msk.msra.mxu1 %vm313_vm1, %v1657_v6 }
  0x3a   : > { %1468 = vmatprep.mubr.msk.f32.mxu0 %vm264_vm0, %v1719_v5 }
  0x3d   : > { %387 = vmatmul.mubr.f32.gmra.mrb[2].mxu0 %v1727_v7 }
  0x3e   : > { %1469 = vmatprep.mubr.msk.f32.mxu0 %vm264_vm0, %v1732_v8 }
  0x41   : > { %392 = vmatmul.mubr.f32.gmra.mrb[4].mxu0 %v1740_v9 }
  0x42   : > { %1470 = vmatprep.mubr.msk.f32.mxu0 %vm264_vm0, %v1745_v10 }
  0x45   : > { %397 = vmatmul.mubr.f32.gmra.mrb[6].mxu0 %v1753_v11 }
  0x46   : > { %1471 = vmatprep.mubr.msk.f32.mxu0 %vm264_vm0, %v1758_v12 }
  0x49   : > { %402 = vmatmul.mubr.f32.gmra.mrb[8].mxu0 %v1766_v13 }
  0x4a   : > { %1472 = vmatprep.mubr.msk.f32.mxu0 %vm264_vm0, %v1771_v14 }
  0x4d   : > { %407 = vmatmul.mubr.f32.gmra.mrb[10].mxu0 %v1779_v15 }
  0x4e   : > { %1473 = vmatprep.mubr.msk.f32.mxu0 %vm264_vm0, %v1784_v16 }
  0x51   : > { %412 = vmatmul.mubr.f32.gmra.mrb[12].mxu0 %v1792_v17 }
  0x52   : > { %1474 = vmatprep.mubr.msk.f32.mxu0 %vm264_vm0, %v1797_v18 }
  0x55   : > { %417 = vmatmul.mubr.f32.gmra.mrb[14].mxu0 %v1805_v19 }
  0x56   : > { %1475 = vmatprep.mubr.msk.f32.mxu0 %vm264_vm0, %v1810_v20 }
  0x59   : > { %422 = vmatmul.mubr.f32.gmra.mrb[16].mxu0 %v1818_v21 }
  0x5a   : > { %1476 = vmatprep.mubr.msk.f32.mxu0 %vm264_vm0, %v1823_v22 }
  0x5d   : > { %427 = vmatmul.mubr.f32.gmra.mrb[18].mxu0 %v1831_v23 }
  0x5e   : > { %1477 = vmatprep.mubr.msk.f32.mxu0 %vm264_vm0, %v1836_v24 }
  0x61   : > { %432 = vmatmul.mubr.f32.gmra.mrb[20].mxu0 %v1844_v25 }
  0x62   : > { %1478 = vmatprep.mubr.msk.f32.mxu0 %vm264_vm0, %v1849_v26 }
  0x65   : > { %437 = vmatmul.mubr.f32.gmra.mrb[22].mxu0 %v1857_v27 }
  0x66   : > { %1479 = vmatprep.mubr.msk.f32.mxu0 %vm264_vm0, %v1862_v28 }
  0x69   : > { %442 = vmatmul.mubr.f32.gmra.mrb[24].mxu0 %v1870_v29 }
  0x6a   : > { %1480 = vmatprep.mubr.msk.f32.mxu0 %vm264_vm0, %v1875_v30 }
  0x6d   : > { %447 = vmatmul.mubr.f32.gmra.mrb[26].mxu0 %v1883_v31 }
  0x6e   : > { %1481 = vmatprep.mubr.msk.f32.mxu0 %vm264_vm0, %v1888_v32 }
  0x71   : > { %452 = vmatmul.mubr.f32.gmra.mrb[28].mxu0 %v1896_v33 }
  0x72   : > { %1482 = vmatprep.mubr.msk.f32.mxu0 %vm264_vm0, %v1901_v34 }
  0x75   : > { %457 = vmatmul.mubr.f32.gmra.mrb[30].mxu0 %v1909_v35 }
  0x76   : > { %1272 = vmatprep.mubr.bf16.mxu0 %v1658_v36 }
 0x10c   : > { %v383_v37 = vpop.f32.mrb[0].mxu0 }
 0x10d   : > { %v463_v38 = vmul.f32 0.0051020407, %v383_v37  ;;  %v385_v39 = vpop.f32.mrb[1].mxu0 }
 0x10f   : > { %481 = vperm.xlu0 %1596, %v463_v38  }
 0x110   : > { %v388_v40 = vpop.f32.mrb[2].mxu0 }
 0x111   : > { %v464_v41 = vmul.f32 0.0051020407, %v388_v40  ;;  %v390_v42 = vpop.f32.mrb[3].mxu0 }
 0x113   : > { %486 = vperm.xlu0 %1596, %v464_v41  }
 0x114   : > { %v393_v43 = vpop.f32.mrb[4].mxu0 }
 0x115   : > { %v465_v44 = vmul.f32 0.0051020407, %v393_v43  ;;  %v395_v45 = vpop.f32.mrb[5].mxu0 }
 0x117   : > { %491 = vperm.xlu1 %1597, %v465_v44  }
 0x118   : > { %v398_v46 = vpop.f32.mrb[6].mxu0 }
 0x119   : > { %v466_v47 = vmul.f32 0.0051020407, %v398_v46  ;;  %v400_v48 = vpop.f32.mrb[7].mxu0 }
 0x11b   : > { %496 = vperm.xlu1 %1597, %v466_v47  }
 0x11c   : > { %v403_v49 = vpop.f32.mrb[8].mxu0 }
 0x11d   : > { %v467_v50 = vmul.f32 0.0051020407, %v403_v49  ;;  %v405_v51 = vpop.f32.mrb[9].mxu0 }
 0x11f   : > { %501 = vperm.xlu0 %1596, %v467_v50  }
 0x120   : > { %v408_v52 = vpop.f32.mrb[10].mxu0 }
 0x121   : > { %v468_v53 = vmul.f32 0.0051020407, %v408_v52  ;;  %v410_v54 = vpop.f32.mrb[11].mxu0  ;;  %v1008_v52 = vld [vmem:[%s2355_s1] sm:$0xff] }
 0x123   : > { %506 = vperm.xlu1 %1597, %v468_v53  }
 0x124   : > { %v413_v55 = vpop.f32.mrb[12].mxu0 }
 0x125   : > { %v469_v56 = vmul.f32 0.0051020407, %v413_v55  ;;  %v415_v57 = vpop.f32.mrb[13].mxu0  ;;  %v1010_v55 = vld [vmem:[%s2355_s1 + $0x10] sm:$0xff] }
 0x126   : > { %v1012_v57 = vld [vmem:[%s2355_s1 + $0x20] sm:$0xff] }
 0x127   : > { %511 = vperm.xlu0 %1596, %v469_v56   ;;  %v1009_v56 = vld [vmem:[%s2355_s1 + $0x8] sm:$0xff] }
 0x128   : > { %v418_v58 = vpop.f32.mrb[14].mxu0 }
 0x129   : > { %v470_v59 = vmul.f32 0.0051020407, %v418_v58  ;;  %v420_v60 = vpop.f32.mrb[15].mxu0  ;;  %v1011_v58 = vld [vmem:[%s2355_s1 + $0x18] sm:$0xff] }
 0x12a   : > { %v1013_v60 = vld [vmem:[%s2355_s1 + $0x28] sm:$0xff] }
 0x12b   : > { %516 = vperm.xlu1 %1597, %v470_v59   ;;  %v1014_v59 = vld [vmem:[%s2355_s1 + $0x30] sm:$0xff] }
 0x12c   : > { %v423_v61 = vpop.f32.mrb[16].mxu0 }
 0x12d   : > { %v471_v62 = vmul.f32 0.0051020407, %v423_v61  ;;  %v425_v63 = vpop.f32.mrb[17].mxu0  ;;  %v1016_v61 = vld [vmem:[%s2355_s1 + $0x40] sm:$0xff] }
 0x12e   : > { %v1018_v63 = vld [vmem:[%s2355_s1 + $0x50] sm:$0xff] }
 0x12f   : > { %521 = vperm.xlu0 %1596, %v471_v62   ;;  %v1015_v62 = vld [vmem:[%s2355_s1 + $0x38] sm:$0xff] }
 0x130   : > { %v428_v1 = vpop.f32.mrb[18].mxu0 }
 0x131   : > { %v472_v2 = vmul.f32 0.0051020407, %v428_v1  ;;  %v430_v3 = vpop.f32.mrb[19].mxu0  ;;  %v1017_v1 = vld [vmem:[%s2355_s1 + $0x48] sm:$0xff] }
 0x132   : > { %v1019_v3 = vld [vmem:[%s2355_s1 + $0x58] sm:$0xff] }
 0x133   : > { %526 = vperm.xlu1 %1597, %v472_v2   ;;  %v1020_v2 = vld [vmem:[%s2355_s1 + $0x60] sm:$0xff] }
 0x134   : > { %v433_v6 = vpop.f32.mrb[20].mxu0 }
 0x135   : > { %v473_v37 = vmul.f32 0.0051020407, %v433_v6  ;;  %v435_v38 = vpop.f32.mrb[21].mxu0  ;;  %v1021_v6 = vld [vmem:[%s2355_s1 + $0x68] sm:$0xff] }
 0x137   : > { %531 = vperm.xlu0 %1596, %v473_v37  }
 0x138   : > { %v438_v39 = vpop.f32.mrb[22].mxu0 }
 0x139   : > { %v474_v40 = vmul.f32 0.0051020407, %v438_v39  ;;  %v440_v41 = vpop.f32.mrb[23].mxu0 }
 0x13b   : > { %536 = vperm.xlu1 %1597, %v474_v40  }
 0x13c   : > { %v443_v42 = vpop.f32.mrb[24].mxu0 }
 0x13d   : > { %v475_v43 = vmul.f32 0.0051020407, %v443_v42  ;;  %v445_v44 = vpop.f32.mrb[25].mxu0 }
 0x13f   : > { %541 = vperm.xlu0 %1596, %v475_v43  }
 0x140   : > { %v448_v45 = vpop.f32.mrb[26].mxu0 }
 0x141   : > { %v476_v46 = vmul.f32 0.0051020407, %v448_v45  ;;  %v450_v47 = vpop.f32.mrb[27].mxu0 }
 0x143   : > { %546 = vperm.xlu1 %1597, %v476_v46  }
 0x144   : > { %v453_v48 = vpop.f32.mrb[28].mxu0 }
 0x145   : > { %v477_v49 = vmul.f32 0.0051020407, %v453_v48  ;;  %v455_v50 = vpop.f32.mrb[29].mxu0 }
 0x147   : > { %551 = vperm.xlu0 %1596, %v477_v49  }
 0x148   : > { %v458_v51 = vpop.f32.mrb[30].mxu0 }
 0x149   : > { %v478_v53 = vmul.f32 0.0051020407, %v458_v51  ;;  %v460_v54 = vpop.f32.mrb[31].mxu0 }
 0x14b   : > { %1026 = vperm.xlu0 %1596, %v1008_v52   ;;  %556 = vperm.xlu1 %1597, %v478_v53  }
 0x14f   : > { %1036 = vperm.xlu0 %1596, %v1010_v55   ;;  %1031 = vperm.xlu1 %1597, %v1009_v56  }
 0x153   : > { %1046 = vperm.xlu0 %1596, %v1012_v57   ;;  %1041 = vperm.xlu1 %1597, %v1011_v58  }
 0x157   : > { %1056 = vperm.xlu0 %1596, %v1014_v59   ;;  %1051 = vperm.xlu1 %1597, %v1013_v60  }
 0x15b   : > { %1066 = vperm.xlu0 %1596, %v1016_v61   ;;  %1061 = vperm.xlu1 %1597, %v1015_v62  }
 0x15f   : > { %1076 = vperm.xlu0 %1596, %v1018_v63   ;;  %1071 = vperm.xlu1 %1597, %v1017_v1  }
 0x163   : > { %1086 = vperm.xlu0 %1596, %v1020_v2   ;;  %1081 = vperm.xlu1 %1597, %v1019_v3  }
 0x167   : > { %1091 = vperm.xlu1 %1597, %v1021_v6  }
 0x18e   : > { %v482_v37 = vpop.permute.xlu0 %481 }
 0x18f   : > { %v1958_v38 = vsub.f32 %v1714_v4, %v482_v37  ;;  %v1961_v39 = vsub.f32 %v1707_v0, %v482_v37 }
 0x191   : > { %v591_v40 = vmul.f32 %v1958_v38, %v1958_v38  ;;  %v592_v41 = vmul.f32 %v1961_v39, %v1961_v39 }
 0x192   : > { %v487_v42 = vpop.permute.xlu0 %486 }
 0x193   : > { %v1968_v43 = vsub.f32 %v1727_v7, %v487_v42  ;;  %v1971_v44 = vsub.f32 %v1719_v5, %v487_v42  ;;  %1484 = vmatprep.mubr.msk.f32.mxu1 %vm264_vm0, %v592_v41 }
 0x194   : > { %736 = vmatmul.mubr.f32.vlgmr.msra.gmra.mrb[0].mxu1 %v591_v40 }
 0x195   : > { %v593_v0 = vmul.f32 %v1968_v43, %v1968_v43  ;;  %v594_v4 = vmul.f32 %v1971_v44, %v1971_v44 }
 0x196   : > { %v492_v45 = vpop.permute.xlu1 %491 }
 0x197   : > { %v1979_v46 = vsub.f32 %v1740_v9, %v492_v45  ;;  %v1982_v47 = vsub.f32 %v1732_v8, %v492_v45  ;;  %1485 = vmatprep.mubr.msk.f32.mxu1 %vm264_vm0, %v594_v4 }
 0x198   : > { %741 = vmatmul.mubr.f32.gmra.mrb[2].mxu1 %v593_v0 }
 0x199   : > { %v595_v5 = vmul.f32 %v1979_v46, %v1979_v46  ;;  %v596_v7 = vmul.f32 %v1982_v47, %v1982_v47 }
 0x19a   : > { %v497_v48 = vpop.permute.xlu1 %496 }
 0x19b   : > { %v1990_v49 = vsub.f32 %v1753_v11, %v497_v48  ;;  %v1993_v50 = vsub.f32 %v1745_v10, %v497_v48  ;;  %1486 = vmatprep.mubr.msk.f32.mxu1 %vm264_vm0, %v596_v7 }
 0x19c   : > { %746 = vmatmul.mubr.f32.gmra.mrb[4].mxu1 %v595_v5 }
 0x19d   : > { %v597_v8 = vmul.f32 %v1990_v49, %v1990_v49  ;;  %v598_v9 = vmul.f32 %v1993_v50, %v1993_v50 }
 0x19e   : > { %v502_v51 = vpop.permute.xlu0 %501 }
 0x19f   : > { %v2001_v52 = vsub.f32 %v1766_v13, %v502_v51  ;;  %v2004_v53 = vsub.f32 %v1758_v12, %v502_v51  ;;  %1487 = vmatprep.mubr.msk.f32.mxu1 %vm264_vm0, %v598_v9 }
 0x1a0   : > { %751 = vmatmul.mubr.f32.gmra.mrb[6].mxu1 %v597_v8 }
 0x1a1   : > { %v599_v10 = vmul.f32 %v2001_v52, %v2001_v52  ;;  %v600_v11 = vmul.f32 %v2004_v53, %v2004_v53 }
 0x1a2   : > { %v507_v54 = vpop.permute.xlu1 %506 }
 0x1a3   : > { %v2012_v55 = vsub.f32 %v1779_v15, %v507_v54  ;;  %v2015_v56 = vsub.f32 %v1771_v14, %v507_v54  ;;  %1488 = vmatprep.mubr.msk.f32.mxu1 %vm264_vm0, %v600_v11 }
 0x1a4   : > { %756 = vmatmul.mubr.f32.gmra.mrb[8].mxu1 %v599_v10 }
 0x1a5   : > { %v601_v12 = vmul.f32 %v2012_v55, %v2012_v55  ;;  %v602_v13 = vmul.f32 %v2015_v56, %v2015_v56 }
 0x1a6   : > { %v512_v57 = vpop.permute.xlu0 %511 }
 0x1a7   : > { %v2023_v58 = vsub.f32 %v1792_v17, %v512_v57  ;;  %v2026_v59 = vsub.f32 %v1784_v16, %v512_v57  ;;  %1489 = vmatprep.mubr.msk.f32.mxu1 %vm264_vm0, %v602_v13 }
 0x1a8   : > { %761 = vmatmul.mubr.f32.gmra.mrb[10].mxu1 %v601_v12 }
 0x1a9   : > { %v603_v14 = vmul.f32 %v2023_v58, %v2023_v58  ;;  %v604_v15 = vmul.f32 %v2026_v59, %v2026_v59 }
 0x1aa   : > { %v517_v60 = vpop.permute.xlu1 %516 }
 0x1ab   : > { %v2034_v61 = vsub.f32 %v1805_v19, %v517_v60  ;;  %v2037_v62 = vsub.f32 %v1797_v18, %v517_v60  ;;  %1490 = vmatprep.mubr.msk.f32.mxu1 %vm264_vm0, %v604_v15 }
 0x1ac   : > { %766 = vmatmul.mubr.f32.gmra.mrb[12].mxu1 %v603_v14 }
 0x1ad   : > { %v605_v16 = vmul.f32 %v2034_v61, %v2034_v61  ;;  %v606_v17 = vmul.f32 %v2037_v62, %v2037_v62 }
 0x1ae   : > { %v522_v63 = vpop.permute.xlu0 %521 }
 0x1af   : > { %v2045_v1 = vsub.f32 %v1818_v21, %v522_v63  ;;  %v2048_v2 = vsub.f32 %v1810_v20, %v522_v63  ;;  %1491 = vmatprep.mubr.msk.f32.mxu1 %vm264_vm0, %v606_v17 }
 0x1b0   : > { %771 = vmatmul.mubr.f32.gmra.mrb[14].mxu1 %v605_v16 }
 0x1b1   : > { %v607_v18 = vmul.f32 %v2045_v1, %v2045_v1  ;;  %v608_v19 = vmul.f32 %v2048_v2, %v2048_v2 }
 0x1b2   : > { %v527_v3 = vpop.permute.xlu1 %526 }
 0x1b3   : > { %v2056_v6 = vsub.f32 %v1831_v23, %v527_v3  ;;  %v2059_v37 = vsub.f32 %v1823_v22, %v527_v3  ;;  %1492 = vmatprep.mubr.msk.f32.mxu1 %vm264_vm0, %v608_v19 }
 0x1b4   : > { %776 = vmatmul.mubr.f32.gmra.mrb[16].mxu1 %v607_v18 }
 0x1b5   : > { %v609_v20 = vmul.f32 %v2056_v6, %v2056_v6  ;;  %v610_v21 = vmul.f32 %v2059_v37, %v2059_v37 }
 0x1b6   : > { %v532_v40 = vpop.permute.xlu0 %531 }
 0x1b7   : > { %v2067_v41 = vsub.f32 %v1844_v25, %v532_v40  ;;  %v2070_v42 = vsub.f32 %v1836_v24, %v532_v40  ;;  %1493 = vmatprep.mubr.msk.f32.mxu1 %vm264_vm0, %v610_v21 }
 0x1b8   : > { %781 = vmatmul.mubr.f32.gmra.mrb[18].mxu1 %v609_v20 }
 0x1b9   : > { %v611_v22 = vmul.f32 %v2067_v41, %v2067_v41  ;;  %v612_v23 = vmul.f32 %v2070_v42, %v2070_v42 }
 0x1ba   : > { %v537_v0 = vpop.permute.xlu1 %536 }
 0x1bb   : > { %v2078_v4 = vsub.f32 %v1857_v27, %v537_v0  ;;  %v2081_v45 = vsub.f32 %v1849_v26, %v537_v0  ;;  %1494 = vmatprep.mubr.msk.f32.mxu1 %vm264_vm0, %v612_v23  ;;  %v864_v23 = vld [vmem:[%s2354_s0] sm:$0xff] }
 0x1bc   : > { %786 = vmatmul.mubr.f32.gmra.mrb[20].mxu1 %v611_v22 }
 0x1bd   : > { %v613_v24 = vmul.f32 %v2078_v4, %v2078_v4  ;;  %v614_v25 = vmul.f32 %v2081_v45, %v2081_v45 }
 0x1be   : > { %v542_v5 = vpop.permute.xlu0 %541 }
 0x1bf   : > { %v2089_v7 = vsub.f32 %v1870_v29, %v542_v5  ;;  %v2092_v48 = vsub.f32 %v1862_v28, %v542_v5  ;;  %1495 = vmatprep.mubr.msk.f32.mxu1 %vm264_vm0, %v614_v25 }
 0x1c0   : > { %791 = vmatmul.mubr.f32.gmra.mrb[22].mxu1 %v613_v24 }
 0x1c1   : > { %v615_v26 = vmul.f32 %v2089_v7, %v2089_v7  ;;  %v616_v27 = vmul.f32 %v2092_v48, %v2092_v48 }
 0x1c2   : > { %v547_v8 = vpop.permute.xlu1 %546 }
 0x1c3   : > { %v2100_v9 = vsub.f32 %v1883_v31, %v547_v8  ;;  %v2103_v51 = vsub.f32 %v1875_v30, %v547_v8  ;;  %1496 = vmatprep.mubr.msk.f32.mxu1 %vm264_vm0, %v616_v27  ;;  %v865_v8 = vld [vmem:[%s2354_s0 + $0x8] sm:$0xff] }
 0x1c4   : > { %796 = vmatmul.mubr.f32.gmra.mrb[24].mxu1 %v615_v26 }
 0x1c5   : > { %v617_v28 = vmul.f32 %v2100_v9, %v2100_v9  ;;  %v618_v29 = vmul.f32 %v2103_v51, %v2103_v51 }
 0x1c6   : > { %v552_v10 = vpop.permute.xlu0 %551 }
 0x1c7   : > { %v2111_v11 = vsub.f32 %v1896_v33, %v552_v10  ;;  %v2114_v54 = vsub.f32 %v1888_v32, %v552_v10  ;;  %1497 = vmatprep.mubr.msk.f32.mxu1 %vm264_vm0, %v618_v29 }
 0x1c8   : > { %801 = vmatmul.mubr.f32.gmra.mrb[26].mxu1 %v617_v28 }
 0x1c9   : > { %v619_v30 = vmul.f32 %v2111_v11, %v2111_v11  ;;  %v620_v31 = vmul.f32 %v2114_v54, %v2114_v54 }
 0x1ca   : > { %v557_v12 = vpop.permute.xlu1 %556 }
 0x1cb   : > { %v2122_v13 = vsub.f32 %v1909_v35, %v557_v12  ;;  %v2125_v57 = vsub.f32 %v1901_v34, %v557_v12  ;;  %1498 = vmatprep.mubr.msk.f32.mxu1 %vm264_vm0, %v620_v31 }
 0x1cc   : > { %806 = vmatmul.mubr.f32.gmra.mrb[28].mxu1 %v619_v30 }
 0x1cd   : > { %v621_v32 = vmul.f32 %v2122_v13, %v2122_v13  ;;  %v622_v33 = vmul.f32 %v2125_v57, %v2125_v57 }
 0x1cf   : > { %1499 = vmatprep.mubr.msk.f32.mxu1 %vm264_vm0, %v622_v33 }
 0x1d0   : > { %811 = vmatmul.mubr.f32.gmra.mrb[30].mxu1 %v621_v32  ;;  %v866_v32 = vld [vmem:[%s2354_s0 + $0x10] sm:$0xff] }
 0x1d1   : > { %1312 = vmatprep.mubr.bf16.mxu1 %v1658_v36 }
 0x267   : > { %v737_v14 = vpop.f32.mrb[0].mxu1 }
 0x268   : > { %v816_v35 = vmul.f32 0.0051020407, %v737_v14  ;;  %v739_v15 = vpop.f32.mrb[1].mxu1 }
 0x26a   : > { %v832_v60 = vadd.f32 1e-05, %v816_v35 }
 0x26b   : > { %v742_v34 = vpop.f32.mrb[2].mxu1 }
 0x26c   : > { %1598 = vrsqrt.f32 %v832_v60  ;;  %v817_v16 = vmul.f32 0.0051020407, %v742_v34  ;;  %v744_v17 = vpop.f32.mrb[3].mxu1 }
 0x26e   : > { %v833_v63 = vadd.f32 1e-05, %v817_v16  ;;  %v867_v16 = vld [vmem:[%s2354_s0 + $0x18] sm:$0xff] }
 0x26f   : > { %v747_v18 = vpop.f32.mrb[4].mxu1 }
 0x270   : > { %1600 = vrsqrt.f32 %v833_v63  ;;  %v818_v19 = vmul.f32 0.0051020407, %v747_v18  ;;  %v749_v3 = vpop.f32.mrb[5].mxu1 }
 0x272   : > { %v834_v20 = vadd.f32 1e-05, %v818_v19 }
 0x273   : > { %v752_v21 = vpop.f32.mrb[6].mxu1 }
 0x274   : > { %1602 = vrsqrt.f32 %v834_v20  ;;  %v819_v40 = vmul.f32 0.0051020407, %v752_v21  ;;  %v754_v22 = vpop.f32.mrb[7].mxu1  ;;  %v868_v21 = vld [vmem:[%s2354_s0 + $0x20] sm:$0xff] }
 0x276   : > { %v1599_v0 = vpop.eup %1598  ;;  %v835_v24 = vadd.f32 1e-05, %v819_v40 }
 0x277   : > { %v757_v25 = vpop.f32.mrb[8].mxu1  ;;  %v880_v5 = vmul.f32 %v1599_v0, %v864_v23 }
 0x278   : > { %1604 = vrsqrt.f32 %v835_v24  ;;  %v820_v26 = vmul.f32 0.0051020407, %v757_v25  ;;  %v759_v27 = vpop.f32.mrb[9].mxu1 }
 0x279   : > { %898 = vperm.xlu0 %1596, %v880_v5   ;;  %v869_v5 = vld [vmem:[%s2354_s0 + $0x28] sm:$0xff] }
 0x27a   : > { %v1601_v28 = vpop.eup %1600  ;;  %v836_v29 = vadd.f32 1e-05, %v820_v26 }
 0x27b   : > { %v762_v10 = vpop.f32.mrb[10].mxu1  ;;  %v881_v30 = vmul.f32 %v1601_v28, %v865_v8 }
 0x27c   : > { %1606 = vrsqrt.f32 %v836_v29  ;;  %v821_v31 = vmul.f32 0.0051020407, %v762_v10  ;;  %v764_v12 = vpop.f32.mrb[11].mxu1 }
 0x27d   : > { %903 = vperm.xlu1 %1597, %v881_v30   ;;  %v870_v30 = vld [vmem:[%s2354_s0 + $0x30] sm:$0xff] }
 0x27e   : > { %v1603_v33 = vpop.eup %1602  ;;  %v837_v14 = vadd.f32 1e-05, %v821_v31 }
 0x27f   : > { %v767_v35 = vpop.f32.mrb[12].mxu1  ;;  %v882_v15 = vmul.f32 %v1603_v33, %v866_v32 }
 0x280   : > { %1608 = vrsqrt.f32 %v837_v14  ;;  %v822_v60 = vmul.f32 0.0051020407, %v767_v35  ;;  %v769_v34 = vpop.f32.mrb[13].mxu1 }
 0x281   : > { %908 = vperm.xlu0 %1596, %v882_v15   ;;  %v871_v15 = vld [vmem:[%s2354_s0 + $0x38] sm:$0xff] }
 0x282   : > { %v1605_v17 = vpop.eup %1604  ;;  %v838_v63 = vadd.f32 1e-05, %v822_v60 }
 0x283   : > { %v772_v18 = vpop.f32.mrb[14].mxu1  ;;  %v883_v19 = vmul.f32 %v1605_v17, %v867_v16 }
 0x284   : > { %1610 = vrsqrt.f32 %v838_v63  ;;  %v823_v3 = vmul.f32 0.0051020407, %v772_v18  ;;  %v774_v20 = vpop.f32.mrb[15].mxu1 }
 0x285   : > { %913 = vperm.xlu1 %1597, %v883_v19   ;;  %v872_v19 = vld [vmem:[%s2354_s0 + $0x40] sm:$0xff] }
 0x286   : > { %v1607_v40 = vpop.eup %1606  ;;  %v839_v22 = vadd.f32 1e-05, %v823_v3 }
 0x287   : > { %v777_v23 = vpop.f32.mrb[16].mxu1  ;;  %v884_v0 = vmul.f32 %v1607_v40, %v868_v21 }
 0x288   : > { %1612 = vrsqrt.f32 %v839_v22  ;;  %v824_v24 = vmul.f32 0.0051020407, %v777_v23  ;;  %v779_v25 = vpop.f32.mrb[17].mxu1 }
 0x289   : > { %918 = vperm.xlu0 %1596, %v884_v0   ;;  %v873_v0 = vld [vmem:[%s2354_s0 + $0x48] sm:$0xff] }
 0x28a   : > { %v1609_v26 = vpop.eup %1608  ;;  %v840_v27 = vadd.f32 1e-05, %v824_v24 }
 0x28b   : > { %v782_v8 = vpop.f32.mrb[18].mxu1  ;;  %v885_v28 = vmul.f32 %v1609_v26, %v869_v5 }
 0x28c   : > { %1614 = vrsqrt.f32 %v840_v27  ;;  %v825_v29 = vmul.f32 0.0051020407, %v782_v8  ;;  %v784_v10 = vpop.f32.mrb[19].mxu1 }
 0x28d   : > { %923 = vperm.xlu1 %1597, %v885_v28   ;;  %v874_v28 = vld [vmem:[%s2354_s0 + $0x50] sm:$0xff] }
 0x28e   : > { %v1611_v31 = vpop.eup %1610  ;;  %v841_v12 = vadd.f32 1e-05, %v825_v29 }
 0x28f   : > { %v787_v32 = vpop.f32.mrb[20].mxu1  ;;  %v886_v33 = vmul.f32 %v1611_v31, %v870_v30 }
 0x290   : > { %1616 = vrsqrt.f32 %v841_v12  ;;  %v826_v14 = vmul.f32 0.0051020407, %v787_v32  ;;  %v789_v35 = vpop.f32.mrb[21].mxu1 }
 0x291   : > { %928 = vperm.xlu0 %1596, %v886_v33   ;;  %v875_v33 = vld [vmem:[%s2354_s0 + $0x58] sm:$0xff] }
 0x292   : > { %v1613_v60 = vpop.eup %1612  ;;  %v842_v34 = vadd.f32 1e-05, %v826_v14 }
 0x293   : > { %v792_v16 = vpop.f32.mrb[22].mxu1  ;;  %v887_v17 = vmul.f32 %v1613_v60, %v871_v15 }
 0x294   : > { %1618 = vrsqrt.f32 %v842_v34  ;;  %v827_v63 = vmul.f32 0.0051020407, %v792_v16  ;;  %v794_v18 = vpop.f32.mrb[23].mxu1 }
 0x295   : > { %933 = vperm.xlu1 %1597, %v887_v17   ;;  %v876_v17 = vld [vmem:[%s2354_s0 + $0x60] sm:$0xff] }
 0x296   : > { %v1615_v3 = vpop.eup %1614  ;;  %v843_v20 = vadd.f32 1e-05, %v827_v63 }
 0x297   : > { %v797_v21 = vpop.f32.mrb[24].mxu1  ;;  %v888_v40 = vmul.f32 %v1615_v3, %v872_v19  ;;  %v877_v3 = vld [vmem:[%s2354_s0 + $0x68] sm:$0xff] }
 0x298   : > { %1620 = vrsqrt.f32 %v843_v20  ;;  %v828_v22 = vmul.f32 0.0051020407, %v797_v21  ;;  %v799_v23 = vpop.f32.mrb[25].mxu1 }
 0x299   : > { %938 = vperm.xlu0 %1596, %v888_v40   ;;  %v878_v40 = vld [vmem:[%s2354_s0 + $0x70] sm:$0xff] }
 0x29a   : > { %v1617_v24 = vpop.eup %1616  ;;  %v844_v25 = vadd.f32 1e-05, %v828_v22 }
 0x29b   : > { %v802_v5 = vpop.f32.mrb[26].mxu1  ;;  %v889_v26 = vmul.f32 %v1617_v24, %v873_v0  ;;  %v879_v0 = vld [vmem:[%s2354_s0 + $0x78] sm:$0xff] }
 0x29c   : > { %1622 = vrsqrt.f32 %v844_v25  ;;  %v829_v27 = vmul.f32 0.0051020407, %v802_v5  ;;  %v804_v8 = vpop.f32.mrb[27].mxu1  ;;  %v1022_v25 = vld [vmem:[%s2355_s1 + $0x70] sm:$0xff] }
 0x29d   : > { %943 = vperm.xlu1 %1597, %v889_v26   ;;  %v1023_v26 = vld [vmem:[%s2355_s1 + $0x78] sm:$0xff]  ;;  %v1032_v8 = vpop.permute.xlu1 %1031 }
 0x29e   : > { %v1619_v29 = vpop.eup %1618  ;;  %v845_v10 = vadd.f32 1e-05, %v829_v27  ;;  %v1027_v27 = vpop.permute.xlu0 %1026 }
 0x29f   : > { %v807_v30 = vpop.f32.mrb[28].mxu1  ;;  %v890_v31 = vmul.f32 %v1619_v29, %v874_v28 }
 0x2a0   : > { %1624 = vrsqrt.f32 %v845_v10  ;;  %v830_v12 = vmul.f32 0.0051020407, %v807_v30  ;;  %v809_v32 = vpop.f32.mrb[29].mxu1 }
 0x2a1   : > { %948 = vperm.xlu0 %1596, %v890_v31   ;;  %v1042_v29 = vpop.permute.xlu1 %1041 }
 0x2a2   : > { %v1621_v14 = vpop.eup %1620  ;;  %v846_v35 = vadd.f32 1e-05, %v830_v12  ;;  %v1037_v28 = vpop.permute.xlu0 %1036 }
 0x2a3   : > { %v812_v15 = vpop.f32.mrb[30].mxu1  ;;  %v891_v60 = vmul.f32 %v1621_v14, %v875_v33 }
 0x2a4   : > { %1626 = vrsqrt.f32 %v846_v35  ;;  %v831_v34 = vmul.f32 0.0051020407, %v812_v15  ;;  %v814_v16 = vpop.f32.mrb[31].mxu1 }
 0x2a5   : > { %953 = vperm.xlu1 %1597, %v891_v60   ;;  %v1052_v30 = vpop.permute.xlu1 %1051 }
 0x2a6   : > { %v1623_v63 = vpop.eup %1622  ;;  %v847_v18 = vadd.f32 1e-05, %v831_v34  ;;  %v1047_v10 = vpop.permute.xlu0 %1046 }
 0x2a7   : > { %v892_v19 = vmul.f32 %v1623_v63, %v876_v17 }
 0x2a8   : > { %1628 = vrsqrt.f32 %v847_v18 }
 0x2a9   : > { %958 = vperm.xlu0 %1596, %v892_v19   ;;  %v2190_v12 = vpop.permute.xlu1 %1061 }
 0x2aa   : > { %v1625_v20 = vpop.eup %1624  ;;  %v2188_v31 = vpop.permute.xlu0 %1056 }
 0x2ab   : > { %v893_v21 = vmul.f32 %v1625_v20, %v877_v3 }
 0x2ad   : > { %963 = vperm.xlu1 %1597, %v893_v21   ;;  %v2194_v33 = vpop.permute.xlu1 %1071 }
 0x2ae   : > { %v1627_v22 = vpop.eup %1626  ;;  %v2192_v32 = vpop.permute.xlu0 %1066 }
 0x2af   : > { %v894_v23 = vmul.f32 %v1627_v22, %v878_v40 }
 0x2b1   : > { %968 = vperm.xlu0 %1596, %v894_v23   ;;  %v2198_v35 = vpop.permute.xlu1 %1081 }
 0x2b2   : > { %v1629_v24 = vpop.eup %1628  ;;  %v2196_v14 = vpop.permute.xlu0 %1076 }
 0x2b3   : > { %v895_v5 = vmul.f32 %v1629_v24, %v879_v0 }
 0x2b5   : > { %1096 = vperm.xlu0 %1596, %v1022_v25   ;;  %973 = vperm.xlu1 %1597, %v895_v5   ;;  %v2202_v60 = vpop.permute.xlu1 %1091 }
 0x2b6   : > { %v2200_v15 = vpop.permute.xlu0 %1086 }
 0x2b9   : > { %1101 = vperm.xlu1 %1597, %v1023_v26  }
 0x2f8   : > { %v899_v34 = vpop.permute.xlu0 %898 }
 0x2f9   : > { %v976_v16 = vmul.f32 %v899_v34, %v1958_v38  ;;  %v977_v17 = vmul.f32 %v899_v34, %v1961_v39 }
 0x2fb   : > { %v1104_v63 = vadd.f32 %v1027_v27, %v976_v16  ;;  %v1105_v18 = vadd.f32 %v1027_v27, %v977_v17 }
 0x2fc   : > { %v904_v19 = vpop.permute.xlu1 %903 }
 0x2fd   : > { %v978_v3 = vmul.f32 %v904_v19, %v1968_v43  ;;  %v979_v20 = vmul.f32 %v904_v19, %v1971_v44  ;;  %v1136_v22 = vmax.f32 %v1104_v63, 0.0  ;;  %v1137_v23 = vmax.f32 %v1105_v18, 0.0 }
 0x2ff   : > { %v1106_v21 = vadd.f32 %v1032_v8, %v978_v3  ;;  %v1107_v40 = vadd.f32 %v1032_v8, %v979_v20 }
 0x300   : > { %v909_v0 = vpop.permute.xlu0 %908 }
 0x301   : > { %v1138_v24 = vmax.f32 %v1106_v21, 0.0  ;;  %v1139_v25 = vmax.f32 %v1107_v40, 0.0  ;;  %v980_v5 = vmul.f32 %v909_v0, %v1979_v46  ;;  %v981_v38 = vmul.f32 %v909_v0, %v1982_v47 }
 0x303   : > { %v1168_v26 = vpack.c.bf16 %v1138_v24, %v1136_v22  ;;  %v1169_v39 = vpack.c.bf16 %v1139_v25, %v1137_v23  ;;  %v1108_v34 = vadd.f32 %v1037_v28, %v980_v5  ;;  %v1109_v27 = vadd.f32 %v1037_v28, %v981_v38 }
 0x304   : > { %v914_v16 = vpop.permute.xlu1 %913 }
 0x305   : > { %1185 = vst.msk [vmem:[#allocation2 + $0x8] sm:$0xff] %vm264_vm0, %v1169_v39  ;;  %v982_v43 = vmul.f32 %v914_v16, %v1990_v49  ;;  %v983_v44 = vmul.f32 %v914_v16, %v1993_v50  ;;  %v1140_v63 = vmax.f32 %v1108_v34, 0.0  ;;  %v1141_v18 = vmax.f32 %v1109_v27, 0.0 }
 0x307   : > { %v1110_v8 = vadd.f32 %v1042_v29, %v982_v43  ;;  %v1111_v17 = vadd.f32 %v1042_v29, %v983_v44 }
 0x308   : > { %v919_v19 = vpop.permute.xlu0 %918 }
 0x309   : > { %v1142_v3 = vmax.f32 %v1110_v8, 0.0  ;;  %v1143_v46 = vmax.f32 %v1111_v17, 0.0  ;;  %v984_v47 = vmul.f32 %v919_v19, %v2001_v52  ;;  %v985_v20 = vmul.f32 %v919_v19, %v2004_v53 }
 0x30b   : > { %v1170_v21 = vpack.c.bf16 %v1142_v3, %v1140_v63  ;;  %v1171_v28 = vpack.c.bf16 %v1143_v46, %v1141_v18  ;;  %v1112_v40 = vadd.f32 %v1047_v10, %v984_v47  ;;  %v1113_v22 = vadd.f32 %v1047_v10, %v985_v20 }
 0x30c   : > { %v924_v23 = vpop.permute.xlu1 %923  ;;  %v1225_v0 = vld [vmem:[#allocation2 + $0x8] sm:$0xff] }
 0x30d   : > { %1187 = vst.msk [vmem:[#allocation2 + $0x18] sm:$0xff] %vm264_vm0, %v1171_v28  ;;  %v986_v49 = vmul.f32 %v924_v23, %v2012_v55  ;;  %v987_v50 = vmul.f32 %v924_v23, %v2015_v56  ;;  %1240 = vmatprep.subr.bf16.mxu0 %v1225_v0  ;;  %1551 = vmatprep.subr.bf16.mxu1 %v1225_v0  ;;  %v1144_v24 = vmax.f32 %v1112_v40, 0.0  ;;  %v1145_v53 = vmax.f32 %v1113_v22, 0.0 }
 0x30e   : > { %1241 = vmatpush1.bf16.msra.mxu0 %v1168_v26  ;;  %1559 = vmatpush1.bf16.msra.mxu1 %v1168_v26 }
 0x30f   : > { %v1114_v29 = vadd.f32 %v1052_v30, %v986_v49  ;;  %v1115_v52 = vadd.f32 %v1052_v30, %v987_v50 }
 0x310   : > { %v929_v25 = vpop.permute.xlu0 %928 }
 0x311   : > { %v1146_v5 = vmax.f32 %v1114_v29, 0.0  ;;  %v1147_v38 = vmax.f32 %v1115_v52, 0.0  ;;  %v988_v10 = vmul.f32 %v929_v25, %v2023_v58  ;;  %v989_v39 = vmul.f32 %v929_v25, %v2026_v59 }
 0x313   : > { %v1172_v34 = vpack.c.bf16 %v1146_v5, %v1144_v24  ;;  %v1173_v27 = vpack.c.bf16 %v1147_v38, %v1145_v53  ;;  %v1116_v55 = vadd.f32 %v2188_v31, %v988_v10  ;;  %v1117_v56 = vadd.f32 %v2188_v31, %v989_v39 }
 0x314   : > { %v934_v16 = vpop.permute.xlu1 %933  ;;  %v1227_v43 = vld [vmem:[#allocation2 + $0x18] sm:$0xff] }
 0x315   : > { %1189 = vst.msk [vmem:[#allocation2 + $0x28] sm:$0xff] %vm264_vm0, %v1173_v27  ;;  %v990_v30 = vmul.f32 %v934_v16, %v2034_v61  ;;  %v991_v26 = vmul.f32 %v934_v16, %v2037_v62  ;;  %1242 = vmatprep.subr.bf16.mxu0 %v1227_v43  ;;  %1552 = vmatprep.subr.bf16.mxu1 %v1227_v43  ;;  %v1148_v44 = vmax.f32 %v1116_v55, 0.0  ;;  %v1149_v8 = vmax.f32 %v1117_v56, 0.0 }
 0x316   : > { %1243 = vmatpush1.bf16.msra.mxu0 %v1170_v21  ;;  %1560 = vmatpush1.bf16.msra.mxu1 %v1170_v21 }
 0x317   : > { %v1118_v58 = vadd.f32 %v2190_v12, %v990_v30  ;;  %v1119_v59 = vadd.f32 %v2190_v12, %v991_v26 }
 0x318   : > { %v939_v17 = vpop.permute.xlu0 %938 }
 0x319   : > { %v1150_v31 = vmax.f32 %v1118_v58, 0.0  ;;  %v1151_v63 = vmax.f32 %v1119_v59, 0.0  ;;  %v992_v18 = vmul.f32 %v939_v17, %v2045_v1  ;;  %v993_v19 = vmul.f32 %v939_v17, %v2048_v2 }
 0x31b   : > { %v1174_v61 = vpack.c.bf16 %v1150_v31, %v1148_v44  ;;  %v1175_v3 = vpack.c.bf16 %v1151_v63, %v1149_v8  ;;  %v1120_v62 = vadd.f32 %v2192_v32, %v992_v18  ;;  %v1121_v46 = vadd.f32 %v2192_v32, %v993_v19 }
 0x31c   : > { %v944_v47 = vpop.permute.xlu1 %943  ;;  %v1229_v20 = vld [vmem:[#allocation2 + $0x28] sm:$0xff] }
 0x31d   : > { %1191 = vst.msk [vmem:[#allocation2 + $0x38] sm:$0xff] %vm264_vm0, %v1175_v3  ;;  %v994_v12 = vmul.f32 %v944_v47, %v2056_v6  ;;  %v995_v21 = vmul.f32 %v944_v47, %v2059_v37  ;;  %1244 = vmatprep.subr.bf16.mxu0 %v1229_v20  ;;  %1553 = vmatprep.subr.bf16.mxu1 %v1229_v20  ;;  %v1152_v28 = vmax.f32 %v1120_v62, 0.0  ;;  %v1153_v40 = vmax.f32 %v1121_v46, 0.0 }
 0x31e   : > { %1245 = vmatpush1.bf16.msra.mxu0 %v1172_v34  ;;  %1561 = vmatpush1.bf16.msra.mxu1 %v1172_v34 }
 0x31f   : > { %v1122_v1 = vadd.f32 %v2194_v33, %v994_v12  ;;  %v1123_v2 = vadd.f32 %v2194_v33, %v995_v21 }
 0x320   : > { %v949_v22 = vpop.permute.xlu0 %948 }
 0x321   : > { %v1154_v32 = vmax.f32 %v1122_v1, 0.0  ;;  %v1155_v23 = vmax.f32 %v1123_v2, 0.0  ;;  %v996_v0 = vmul.f32 %v949_v22, %v2067_v41  ;;  %v997_v49 = vmul.f32 %v949_v22, %v2070_v42  ;;  %v1208_v2 = vld [vmem:[%s2267_s14 + $0x40] sm:$0xff] }
 0x323   : > { %v1176_v6 = vpack.c.bf16 %v1154_v32, %v1152_v28  ;;  %v1177_v50 = vpack.c.bf16 %v1155_v23, %v1153_v40  ;;  %v1124_v37 = vadd.f32 %v2196_v14, %v996_v0  ;;  %v1125_v29 = vadd.f32 %v2196_v14, %v997_v49  ;;  %v1209_v28 = vld [vmem:[%s2267_s14 + $0x48] sm:$0xff]  ;;  %v1202_v23 = vld [vmem:[%s2267_s14 + $0x10] sm:$0xff]  ;;  %v1203_v0 = vld [vmem:[%s2267_s14 + $0x18] sm:$0xff] }
 0x324   : > { %v954_v52 = vpop.permute.xlu1 %953  ;;  %v1231_v24 = vld [vmem:[#allocation2 + $0x38] sm:$0xff]  ;;  %v1220_v32 = vpack.c.bf16 %v1209_v28, %v1208_v2  ;;  %v1210_v49 = vld [vmem:[%s2267_s14 + $0x50] sm:$0xff] }
 0x325   : > { %1193 = vst.msk [vmem:[#allocation2 + $0x48] sm:$0xff] %vm264_vm0, %v1177_v50  ;;  %v998_v33 = vmul.f32 %v954_v52, %v2078_v4  ;;  %v999_v53 = vmul.f32 %v954_v52, %v2081_v45  ;;  %1246 = vmatprep.subr.bf16.mxu0 %v1231_v24  ;;  %1554 = vmatprep.subr.bf16.mxu1 %v1231_v24  ;;  %v1156_v25 = vmax.f32 %v1124_v37, 0.0  ;;  %v1157_v5 = vmax.f32 %v1125_v29, 0.0  ;;  %v1204_v29 = vld [vmem:[%s2267_s14 + $0x20] sm:$0xff]  ;;  %v1205_v52 = vld [vmem:[%s2267_s14 + $0x28] sm:$0xff] }
 0x326   : > { %1247 = vmatpush1.bf16.msra.mxu0 %v1174_v61  ;;  %1562 = vmatpush1.bf16.msra.mxu1 %v1174_v61  ;;  %v1217_v50 = vpack.c.bf16 %v1203_v0, %v1202_v23  ;;  %v1212_v24 = vld [vmem:[%s2267_s14 + $0x60] sm:$0xff] }
 0x327   : > { %v1126_v41 = vadd.f32 %v2198_v35, %v998_v33  ;;  %v1127_v42 = vadd.f32 %v2198_v35, %v999_v53  ;;  %v1213_v33 = vld [vmem:[%s2267_s14 + $0x68] sm:$0xff]  ;;  %v1218_v53 = vpack.c.bf16 %v1205_v52, %v1204_v29 }
 0x328   : > { %v959_v38 = vpop.permute.xlu0 %958 }
 0x329   : > { %v1158_v14 = vmax.f32 %v1126_v41, 0.0  ;;  %v1159_v10 = vmax.f32 %v1127_v42, 0.0  ;;  %v1000_v39 = vmul.f32 %v959_v38, %v2089_v7  ;;  %v1001_v34 = vmul.f32 %v959_v38, %v2092_v48  ;;  %v1206_v42 = vld [vmem:[%s2267_s14 + $0x30] sm:$0xff]  ;;  %v1215_v38 = vld [vmem:[%s2267_s14 + $0x78] sm:$0xff] }
 0x32a   : > { %v1222_v41 = vpack.c.bf16 %v1213_v33, %v1212_v24 }
 0x32b   : > { %v1178_v4 = vpack.c.bf16 %v1158_v14, %v1156_v25  ;;  %v1179_v27 = vpack.c.bf16 %v1159_v10, %v1157_v5  ;;  %v1128_v45 = vadd.f32 %v2200_v15, %v1000_v39  ;;  %v1129_v35 = vadd.f32 %v2200_v15, %v1001_v34  ;;  %v1207_v25 = vld [vmem:[%s2267_s14 + $0x38] sm:$0xff]  ;;  %v1214_v5 = vld [vmem:[%s2267_s14 + $0x70] sm:$0xff] }
 0x32c   : > { %v964_v55 = vpop.permute.xlu1 %963  ;;  %v1233_v56 = vld [vmem:[#allocation2 + $0x48] sm:$0xff]  ;;  %v1219_v14 = vpack.c.bf16 %v1207_v25, %v1206_v42  ;;  %v1223_v10 = vpack.c.bf16 %v1215_v38, %v1214_v5 }
 0x32d   : > { %1195 = vst.msk [vmem:[#allocation2 + $0x58] sm:$0xff] %vm264_vm0, %v1179_v27  ;;  %v1002_v16 = vmul.f32 %v964_v55, %v2100_v9  ;;  %v1003_v43 = vmul.f32 %v964_v55, %v2103_v51  ;;  %1248 = vmatprep.subr.bf16.mxu0 %v1233_v56  ;;  %1555 = vmatprep.subr.bf16.mxu1 %v1233_v56  ;;  %v1160_v26 = vmax.f32 %v1128_v45, 0.0  ;;  %v1161_v58 = vmax.f32 %v1129_v35, 0.0 }
 0x32e   : > { %1249 = vmatpush1.bf16.msra.mxu0 %v1176_v6  ;;  %1563 = vmatpush1.bf16.msra.mxu1 %v1176_v6  ;;  %v1211_v6 = vld [vmem:[%s2267_s14 + $0x58] sm:$0xff] }
 0x32f   : > { %v1130_v7 = vadd.f32 %v2202_v60, %v1002_v16  ;;  %v1131_v48 = vadd.f32 %v2202_v60, %v1003_v43  ;;  %v1221_v37 = vpack.c.bf16 %v1211_v6, %v1210_v49 }
 0x330   : > { %v969_v30 = vpop.permute.xlu0 %968 }
 0x331   : > { %v1162_v59 = vmax.f32 %v1130_v7, 0.0  ;;  %v1163_v44 = vmax.f32 %v1131_v48, 0.0  ;;  %v1004_v51 = vmul.f32 %v969_v30, %v2111_v11  ;;  %v1005_v63 = vmul.f32 %v969_v30, %v2114_v54 }
 0x333   : > { %v1180_v8 = vpack.c.bf16 %v1162_v59, %v1160_v26  ;;  %v1181_v15 = vpack.c.bf16 %v1163_v44, %v1161_v58 }
 0x334   : > { %v1097_v17 = vpop.permute.xlu0 %1096  ;;  %v974_v9 = vpop.permute.xlu1 %973  ;;  %v1235_v31 = vld [vmem:[#allocation2 + $0x58] sm:$0xff] }
 0x335   : > { %1197 = vst.msk [vmem:[#allocation2 + $0x68] sm:$0xff] %vm264_vm0, %v1181_v15  ;;  %1250 = vmatprep.subr.bf16.mxu0 %v1235_v31  ;;  %1556 = vmatprep.subr.bf16.mxu1 %v1235_v31  ;;  %v1132_v60 = vadd.f32 %v1097_v17, %v1004_v51  ;;  %v1133_v18 = vadd.f32 %v1097_v17, %v1005_v63 }
 0x336   : > { %1251 = vmatpush1.bf16.msra.mxu0 %v1178_v4  ;;  %v1006_v19 = vmul.f32 %v974_v9, %v2122_v13  ;;  %v1007_v61 = vmul.f32 %v974_v9, %v2125_v57  ;;  %1564 = vmatpush1.bf16.msra.mxu1 %v1178_v4  ;;  %v1200_v13 = vld [vmem:[%s2267_s14] sm:$0xff]  ;;  %v1201_v57 = vld [vmem:[%s2267_s14 + $0x8] sm:$0xff] }
 0x337   : > { %v1164_v11 = vmax.f32 %v1132_v60, 0.0  ;;  %v1165_v47 = vmax.f32 %v1133_v18, 0.0  ;;  %v1216_v22 = vpack.c.bf16 %v1201_v57, %v1200_v13 }
 0x338   : > { %v1102_v3 = vpop.permute.xlu1 %1101 }
 0x339   : > { %v1134_v62 = vadd.f32 %v1102_v3, %v1006_v19  ;;  %v1135_v46 = vadd.f32 %v1102_v3, %v1007_v61 }
 0x33b   : > { %v1166_v54 = vmax.f32 %v1134_v62, 0.0  ;;  %v1167_v20 = vmax.f32 %v1135_v46, 0.0 }
 0x33c   : > { %v1237_v12 = vld [vmem:[#allocation2 + $0x68] sm:$0xff] }
 0x33d   : > { %v1182_v21 = vpack.c.bf16 %v1166_v54, %v1164_v11  ;;  %v1183_v1 = vpack.c.bf16 %v1167_v20, %v1165_v47  ;;  %1252 = vmatprep.subr.bf16.mxu0 %v1237_v12  ;;  %1557 = vmatprep.subr.bf16.mxu1 %v1237_v12 }
 0x33e   : > { %1253 = vmatpush1.bf16.msra.mxu0 %v1180_v8  ;;  %1565 = vmatpush1.bf16.msra.mxu1 %v1180_v8 }
 0x33f   : > { %1199 = vst.msk [vmem:[#allocation2 + $0x78] sm:$0xff] %vm264_vm0, %v1183_v1 }
 0x346   : > { %v1239_v40 = vld [vmem:[#allocation2 + $0x78] sm:$0xff] }
 0x347   : > { %1254 = vmatprep.subr.bf16.mxu0 %v1239_v40  ;;  %1558 = vmatprep.subr.bf16.mxu1 %v1239_v40 }
 0x348   : > { %1255 = vmatpush1.bf16.msra.mxu0 %v1182_v21  ;;  %1566 = vmatpush1.bf16.msra.mxu1 %v1182_v21 }
 0x34b   : > { %1273 = vmatmul.mubr.bf16.vlgmr.msra.gmra.mrb[32].mxu0 %v1216_v22  ;;  %1313 = vmatmul.mubr.bf16.vlgmr.msra.gmra.mrb[32].mxu1 %v1220_v32 }
 0x34c   : > { %1282 = vmatprep.mubr.bf16.mxu0 %v1658_v36  ;;  %1322 = vmatprep.mubr.bf16.mxu1 %v1658_v36 }
 0x353   : > { %1283 = vmatmul.mubr.bf16.gmra.mrb[36].mxu0 %v1217_v50  ;;  %1323 = vmatmul.mubr.bf16.gmra.mrb[36].mxu1 %v1221_v37 }
 0x354   : > { %1292 = vmatprep.mubr.bf16.mxu0 %v1658_v36  ;;  %1332 = vmatprep.mubr.bf16.mxu1 %v1658_v36 }
 0x35b   : > { %1293 = vmatmul.mubr.bf16.gmra.mrb[40].mxu0 %v1218_v53  ;;  %1333 = vmatmul.mubr.bf16.gmra.mrb[40].mxu1 %v1222_v41 }
 0x35c   : > { %1302 = vmatprep.mubr.bf16.mxu0 %v1658_v36  ;;  %1342 = vmatprep.mubr.bf16.mxu1 %v1658_v36 }
 0x363   : > { %1303 = vmatmul.mubr.bf16.gmra.mrb[44].mxu0 %v1219_v14  ;;  %1343 = vmatmul.mubr.bf16.gmra.mrb[44].mxu1 %v1223_v10 }
 0x41e   : > { %v1274_v36 = vpop.f32.mrb[32].mxu0  ;;  %v1314_v39 = vpop.f32.mrb[32].mxu1 }
 0x41f   : > { %1353 = vst [vmem:[%s2295_s22] sm:$0xff] %v1274_v36  ;;  %1370 = vst [vmem:[%s2295_s22 + $0x80] sm:$0xff] %v1314_v39  ;;  %v1276_v34 = vpop.f32.mrb[33].mxu0  ;;  %v1316_v4 = vpop.f32.mrb[33].mxu1 }
 0x420   : > { %1355 = vst.msk [vmem:[%s2295_s22 + $0x8] sm:$0xff] %vm264_vm0, %v1276_v34  ;;  %1371 = vst.msk [vmem:[%s2295_s22 + $0x88] sm:$0xff] %vm264_vm0, %v1316_v4  ;;  %v1278_v27 = vpop.f32.mrb[34].mxu0  ;;  %v1318_v45 = vpop.f32.mrb[34].mxu1 }
 0x421   : > { %1356 = vst [vmem:[%s2295_s22 + $0x10] sm:$0xff] %v1278_v27  ;;  %1372 = vst [vmem:[%s2295_s22 + $0x90] sm:$0xff] %v1318_v45  ;;  %v1280_v55 = vpop.f32.mrb[35].mxu0  ;;  %v1320_v56 = vpop.f32.mrb[35].mxu1 }
 0x422   : > { %1357 = vst.msk [vmem:[%s2295_s22 + $0x18] sm:$0xff] %vm264_vm0, %v1280_v55  ;;  %1373 = vst.msk [vmem:[%s2295_s22 + $0x98] sm:$0xff] %vm264_vm0, %v1320_v56 }
 0x426   : > { %v1284_v35 = vpop.f32.mrb[36].mxu0  ;;  %v1324_v16 = vpop.f32.mrb[36].mxu1 }
 0x427   : > { %1358 = vst [vmem:[%s2295_s22 + $0x20] sm:$0xff] %v1284_v35  ;;  %1374 = vst [vmem:[%s2295_s22 + $0xa0] sm:$0xff] %v1324_v16  ;;  %v1286_v43 = vpop.f32.mrb[37].mxu0  ;;  %v1326_v7 = vpop.f32.mrb[37].mxu1 }
 0x428   : > { %1359 = vst.msk [vmem:[%s2295_s22 + $0x28] sm:$0xff] %vm264_vm0, %v1286_v43  ;;  %1375 = vst.msk [vmem:[%s2295_s22 + $0xa8] sm:$0xff] %vm264_vm0, %v1326_v7  ;;  %v1288_v48 = vpop.f32.mrb[38].mxu0  ;;  %v1328_v30 = vpop.f32.mrb[38].mxu1 }
 0x429   : > { %1360 = vst [vmem:[%s2295_s22 + $0x30] sm:$0xff] %v1288_v48  ;;  %1376 = vst [vmem:[%s2295_s22 + $0xb0] sm:$0xff] %v1328_v30  ;;  %v1290_v26 = vpop.f32.mrb[39].mxu0  ;;  %v1330_v58 = vpop.f32.mrb[39].mxu1 }
 0x42a   : > { %1361 = vst.msk [vmem:[%s2295_s22 + $0x38] sm:$0xff] %vm264_vm0, %v1290_v26  ;;  %1377 = vst.msk [vmem:[%s2295_s22 + $0xb8] sm:$0xff] %vm264_vm0, %v1330_v58 }
 0x42e   : > { %v1294_v59 = vpop.f32.mrb[40].mxu0  ;;  %v1334_v44 = vpop.f32.mrb[40].mxu1 }
 0x42f   : > { %1362 = vst [vmem:[%s2295_s22 + $0x40] sm:$0xff] %v1294_v59  ;;  %1378 = vst [vmem:[%s2295_s22 + $0xc0] sm:$0xff] %v1334_v44  ;;  %v1296_v8 = vpop.f32.mrb[41].mxu0  ;;  %v1336_v15 = vpop.f32.mrb[41].mxu1 }
 0x430   : > { %1363 = vst.msk [vmem:[%s2295_s22 + $0x48] sm:$0xff] %vm264_vm0, %v1296_v8  ;;  %1379 = vst.msk [vmem:[%s2295_s22 + $0xc8] sm:$0xff] %vm264_vm0, %v1336_v15  ;;  %v1298_v17 = vpop.f32.mrb[42].mxu0  ;;  %v1338_v9 = vpop.f32.mrb[42].mxu1 }
 0x431   : > { %1364 = vst [vmem:[%s2295_s22 + $0x50] sm:$0xff] %v1298_v17  ;;  %1380 = vst [vmem:[%s2295_s22 + $0xd0] sm:$0xff] %v1338_v9  ;;  %v1300_v31 = vpop.f32.mrb[43].mxu0  ;;  %v1340_v51 = vpop.f32.mrb[43].mxu1 }
 0x432   : > { %1365 = vst.msk [vmem:[%s2295_s22 + $0x58] sm:$0xff] %vm264_vm0, %v1300_v31  ;;  %1381 = vst.msk [vmem:[%s2295_s22 + $0xd8] sm:$0xff] %vm264_vm0, %v1340_v51 }
 0x436   : > { %v1304_v63 = vpop.f32.mrb[44].mxu0  ;;  %v1344_v60 = vpop.f32.mrb[44].mxu1 }
 0x437   : > { %1366 = vst [vmem:[%s2295_s22 + $0x60] sm:$0xff] %v1304_v63  ;;  %1382 = vst [vmem:[%s2295_s22 + $0xe0] sm:$0xff] %v1344_v60  ;;  %v1306_v18 = vpop.f32.mrb[45].mxu0  ;;  %v1346_v19 = vpop.f32.mrb[45].mxu1 }
 0x438   : > { %1367 = vst.msk [vmem:[%s2295_s22 + $0x68] sm:$0xff] %vm264_vm0, %v1306_v18  ;;  %1383 = vst.msk [vmem:[%s2295_s22 + $0xe8] sm:$0xff] %vm264_vm0, %v1346_v19  ;;  %v1308_v61 = vpop.f32.mrb[46].mxu0  ;;  %v1348_v3 = vpop.f32.mrb[46].mxu1 }
 0x439   : > { %1368 = vst [vmem:[%s2295_s22 + $0x70] sm:$0xff] %v1308_v61  ;;  %1384 = vst [vmem:[%s2295_s22 + $0xf0] sm:$0xff] %v1348_v3  ;;  %v1310_v62 = vpop.f32.mrb[47].mxu0  ;;  %v1350_v46 = vpop.f32.mrb[47].mxu1 }
 0x43a   : > { %1369 = vst.msk [vmem:[%s2295_s22 + $0x78] sm:$0xff] %vm264_vm0, %v1310_v62  ;;  %1385 = vst.msk [vmem:[%s2295_s22 + $0xf8] sm:$0xff] %vm264_vm0, %v1350_v46 }
 0x43b PF: > { %s14_s17 = sadd.s32 1, %s1652_s17   ;;  %s2359_s15 = smov %s1648_s16 }
 0x43c   : > { %p11_p5 = scmp.ge.s32.totalorder %s14_s17, 4   ;;  %s2360_s16 = smov %s2362_s18 }
 0x43e   :  { %13 = sbr.rel (!%p11_p5) target bundleno = 2 (0x2), region = 70 }

</bundles_post_ra>
